<compile_context>
chip_gen: v7x
topology: tpu7x:2x2x1
jax: 0.10.0
libtpu: 0.0.40
codegen_flags: <defaults>
</compile_context>

<pallas_src>
import functools
import math

import jax
import jax.numpy as jnp
from jax.experimental import pallas as pl
from jax.experimental.pallas import tpu as pltpu

_LANES = 128
_SUBLANES = 8
# Per-input per-block VMEM target (~4 MiB).  2 inputs x 2 pipeline buffers
# => ~16 MiB, under the explicit 32 MiB scoped-VMEM limit set below.
_TARGET_BLOCK_BYTES = 4 * 1024 * 1024
# Below this many rows, a single block is cheapest (splitting across the two
# v7x TensorCores is not worth the per-step overhead).
_MIN_SPLIT_ROWS = 1024


def _ceil_div(a, b):
    return -(-a // b)


def _round_up(a, b):
    return _ceil_div(a, b) * b


def _choose_tiling(rows, cols, itemsize):
    """Pick (tile_rows, num_blocks).

    - Single full-extent block for small inputs (block dim == array dim is
      exempt from the 8-row divisibility rule, so no masking needed).
    - Otherwise: blocks capped at ~_TARGET_BLOCK_BYTES of VMEM, num_blocks
      forced even so the "parallel" grid axis feeds both TCs on v7x with
      balanced work.
    """
    lanes = _round_up(cols, _LANES)
    max_tile_rows = max(
        _SUBLANES,
        (_TARGET_BLOCK_BYTES // (lanes * itemsize)) // _SUBLANES * _SUBLANES,
    )
    if rows <= _SUBLANES or (rows <= _MIN_SPLIT_ROWS and rows <= max_tile_rows):
        return rows, 1
    num_blocks = max(2, _ceil_div(rows, max_tile_rows))
    num_blocks = _round_up(num_blocks, 2)  # even -> balanced across 2 TCs (v7x)
    tile_rows = _round_up(_ceil_div(rows, num_blocks), _SUBLANES)
    return tile_rows, num_blocks


def _bce_partial_kernel(x_ref, y_ref, o_ref, *, tile_rows, cols, total_rows,
                        need_mask):
    """Per-block partial sum of element-wise BCE-with-logits losses.

    Numerically-stable formulation (matches PyTorch BCEWithLogits):
        loss = max(x, 0) - x*y + log1p(exp(-|x|))
    Ragged last block: rows >= total_rows contain garbage (OOB DMA); they are
    forced to exactly 0 via a select on the *loss* (NaN/Inf in the unselected
    branch cannot propagate through a select).
    Emits a lane-dense (8, cols) partial per grid step using pure per-vreg VPU
    adds (sublane-group reshape + sum over the leading axis, no XLU).
    """
    x = x_ref[...].astype(jnp.float32)
    y = y_ref[...].astype(jnp.float32)
    loss = jnp.maximum(x, 0.0) - x * y + jnp.log1p(jnp.exp(-jnp.abs(x)))

    if need_mask:
        row0 = pl.program_id(0) * tile_rows
        row_idx = jax.lax.broadcasted_iota(jnp.int32, (tile_rows, 1), 0) + row0
        loss = jnp.where(row_idx < total_rows, loss, 0.0)

    if tile_rows % _SUBLANES == 0:
        partial = jnp.sum(
            loss.reshape(tile_rows // _SUBLANES, _SUBLANES, cols), axis=0)
        o_ref[...] = partial.reshape(1, _SUBLANES, cols)
    else:
        # Tiny single-block case only (tile_rows == full row extent < 8 or not
        # a multiple of 8): a small sublane reduce is negligible.
        o_ref[...] = jnp.sum(loss, axis=0, keepdims=True).reshape(1, 1, cols)


@functools.partial(jax.jit, static_argnames=("reduction",))
def bce_with_logits_loss(logits, targets, weight=None, reduction="mean"):
    """Pallas TPU implementation of F.binary_cross_entropy_with_logits.

    Args:
      logits:  (batch, num_classes) float array (f32 or bf16).
      targets: (batch, num_classes) float array (multi-label 0/1 targets).
      weight:  must be None (module default).
      reduction: 'mean' (default) or 'sum'.
    Returns:
      scalar float32 loss.
    """
    if weight is not None:
        # TODO(synk): per-class `weight` not implemented (module default None).
        raise NotImplementedError("weight is not supported")
    assert logits.shape == targets.shape
    n = math.prod(logits.shape)

    # Zero-copy 2-D presentation of the data (no jnp.pad, no prefix slice).
    if n % _LANES == 0:
        rows, cols = n // _LANES, _LANES          # lane-dense fast path
    elif logits.ndim >= 2:
        cols = logits.shape[-1]                   # natural layout: classes on lanes
        rows = n // cols
    else:
        rows, cols = 1, n                         # degenerate 1-D fallback
    x2 = logits.reshape(rows, cols)
    y2 = targets.reshape(rows, cols)

    itemsize = max(jnp.dtype(logits.dtype).itemsize,
                   jnp.dtype(targets.dtype).itemsize)
    tile_rows, num_blocks = _choose_tiling(rows, cols, itemsize)
    need_mask = (tile_rows * num_blocks != rows)
    p_sub = _SUBLANES if tile_rows % _SUBLANES == 0 else 1

    kernel = functools.partial(
        _bce_partial_kernel,
        tile_rows=tile_rows, cols=cols, total_rows=rows, need_mask=need_mask)

    out_bytes = num_blocks * p_sub * cols * 4
    cost = pl.CostEstimate(
        flops=10 * n,
        transcendentals=2 * n,
        bytes_accessed=int(x2.size * jnp.dtype(x2.dtype).itemsize
                           + y2.size * jnp.dtype(y2.dtype).itemsize
                           + out_bytes),
    )

    partials = pl.pallas_call(
        kernel,
        out_shape=jax.ShapeDtypeStruct((num_blocks, p_sub, cols), jnp.float32),
        grid_spec=pl.GridSpec(
            grid=(num_blocks,),
            in_specs=[
                pl.BlockSpec((tile_rows, cols), lambda i: (i, 0)),
                pl.BlockSpec((tile_rows, cols), lambda i: (i, 0)),
            ],
            out_specs=pl.BlockSpec((1, p_sub, cols), lambda i: (i, 0, 0)),
        ),
        compiler_params=pltpu.CompilerParams(
            # Independent per-block partials -> safe to shard across the two
            # TensorCores on v7x (no-op on single-TC v5e/v6e).
            dimension_semantics=("parallel",),
            # 2 inputs x 2 pipeline buffers x ~4 MiB = ~16 MiB; raise the
            # scoped limit explicitly so v5e (16 MiB default) compiles too.
            vmem_limit_bytes=32 * 1024 * 1024,
        ),
        cost_estimate=cost,
    )(x2, y2)

    total = jnp.sum(partials)  # tiny (num_blocks, p_sub, cols) reduce outside

    if reduction == "mean":
        return total / jnp.float32(n)
    elif reduction == "sum":
        return total
    else:
        # TODO(synk): reduction='none' (elementwise output) not implemented;
        # the module default path is 'mean' with weight=None.
        raise NotImplementedError(reduction)


def _ref_bce(logits, targets):
    return (jnp.maximum(logits, 0.0) - logits * targets
            + jnp.log1p(jnp.exp(-jnp.abs(logits))))


if __name__ == "__main__":
    key = jax.random.PRNGKey(0)
    k1, k2, k3, k4 = jax.random.split(key, 4)

    # Module-typical shape: (batch, num_classes), num_classes NOT 128-aligned
    # -> exercises the natural-layout zero-copy path with row masking.
    batch, num_classes = 8, 12
    logits = jax.random.normal(k1, (batch, num_classes), dtype=jnp.float32)
    targets = (jax.random.uniform(k2, (batch, num_classes)) > 0.5).astype(
        jnp.float32)

    loss = bce_with_logits_loss(logits, targets, reduction="mean")
    jax.block_until_ready(loss)
    ref = jnp.mean(_ref_bce(logits, targets))
    assert jnp.allclose(loss, ref, rtol=1e-5, atol=1e-5), (loss, ref)

    # Second small case: 128-aligned element count -> lane-dense zero-copy path.
    batch2, classes2 = 16, 64  # n = 1024
    logits2 = jax.random.normal(k3, (batch2, classes2), dtype=jnp.float32)
    targets2 = (jax.random.uniform(k4, (batch2, classes2)) > 0.5).astype(
        jnp.float32)

    loss2 = bce_with_logits_loss(logits2, targets2, reduction="mean")
    jax.block_until_ready(loss2)
    ref2 = jnp.mean(_ref_bce(logits2, targets2))
    assert jnp.allclose(loss2, ref2, rtol=1e-5, atol=1e-5), (loss2, ref2)

    print("KERNEL_OK")
</pallas_src>

<mosaic_0001>
module attributes {stable_mosaic.version = 11 : i64} {
  func.func @_bce_partial_kernel(%arg0: i32, %arg1: memref<8x12xf32, #tpu.memory_space<vmem>>, %arg2: memref<8x12xf32, #tpu.memory_space<vmem>>, %arg3: memref<1x8x12xf32, #tpu.memory_space<vmem>>) attributes {dimension_semantics = [#tpu.dimension_semantics<parallel>], iteration_bounds = array<i64: 1>, scalar_prefetch = 0 : i64, scratch_operands = 0 : i64, tpu.core_type = #tpu.core_type<tc>, window_params = [{transform_indices = @transform_0, window_bounds = array<i64: 8, 12>}, {transform_indices = @transform_1, window_bounds = array<i64: 8, 12>}, {transform_indices = @transform_2, window_bounds = array<i64: 1, 8, 12>}]} {
    %c0 = arith.constant 0 : index
    %c0_0 = arith.constant 0 : index
    %0 = vector.load %arg1[%c0, %c0_0] : memref<8x12xf32, #tpu.memory_space<vmem>>, vector<8x12xf32>
    %c0_1 = arith.constant 0 : index
    %c0_2 = arith.constant 0 : index
    %1 = vector.load %arg2[%c0_1, %c0_2] : memref<8x12xf32, #tpu.memory_space<vmem>>, vector<8x12xf32>
    %cst = arith.constant 0.000000e+00 : f32
    %2 = vector.broadcast %cst : f32 to vector<8x12xf32>
    %3 = arith.maximumf %0, %2 : vector<8x12xf32>
    %4 = arith.mulf %0, %1 : vector<8x12xf32>
    %5 = arith.subf %3, %4 : vector<8x12xf32>
    %6 = math.absf %0 : vector<8x12xf32>
    %cst_3 = arith.constant 0.000000e+00 : f32
    %7 = vector.broadcast %cst_3 : f32 to vector<8x12xf32>
    %8 = arith.subf %7, %6 : vector<8x12xf32>
    %9 = math.exp %8 : vector<8x12xf32>
    %10 = math.log1p %9 : vector<8x12xf32>
    %11 = arith.addf %5, %10 : vector<8x12xf32>
    %12 = vector.shape_cast %11 : vector<8x12xf32> to vector<1x8x12xf32>
    %cst_4 = arith.constant dense<0.000000e+00> : vector<8x12xf32>
    %13 = vector.multi_reduction <add>, %12, %cst_4 [0] : vector<1x8x12xf32> to vector<8x12xf32>
    %14 = vector.shape_cast %13 : vector<8x12xf32> to vector<1x8x12xf32>
    %c0_5 = arith.constant 0 : index
    %c0_6 = arith.constant 0 : index
    %c0_7 = arith.constant 0 : index
    %15 = vector.load %arg3[%c0_5, %c0_6, %c0_7] : memref<1x8x12xf32, #tpu.memory_space<vmem>>, vector<1x8x12xf32>
    tpu.vector_store %arg3[%c0_5, %c0_6, %c0_7], %14 {strides = array<i32>} : memref<1x8x12xf32, #tpu.memory_space<vmem>>, vector<1x8x12xf32>,
    return
  }
  func.func @transform_0(%arg0: i32) -> (i32, i32) {
    %c0_i32 = arith.constant 0 : i32
    %c0_i32_0 = arith.constant 0 : i32
    return %arg0, %c0_i32 : i32, i32
  }
  func.func @transform_1(%arg0: i32) -> (i32, i32) {
    %c0_i32 = arith.constant 0 : i32
    %c0_i32_0 = arith.constant 0 : i32
    return %arg0, %c0_i32 : i32, i32
  }
  func.func @transform_2(%arg0: i32) -> (i32, i32, i32) {
    %c0_i32 = arith.constant 0 : i32
    %c0_i32_0 = arith.constant 0 : i32
    %c0_i32_1 = arith.constant 0 : i32
    return %arg0, %c0_i32, %c0_i32_0 : i32, i32, i32
  }
}

</mosaic_0001>

<bundles_post_ra>
// kernel: bce_with_logits_loss.1
= control target key start
LH: loop header
LB: loop body
LE: loop exit
PB: predicated region body
PF: predicated region fallthrough
CT: control target
= control target key end

     0   :  { %7 = vsyncpa [#allocation3], 0  ;;  %s161_s0 = inlined_call_operand.hbm [shape: f32[8,12], index: 0, kind: input, shape index: {}]   ;;  %s162_s1 = inlined_call_operand.hbm [shape: f32[8,12], index: 1, kind: input, shape index: {}]   ;;  %s163_s2 = inlined_call_operand.vmem [shape: f32[1,8,12], index: 2, kind: output, shape index: {}]  }
   0x1   :  { %8 = vsyncpa [#allocation5], 0  ;;  %s117_s9 = smov [#allocation2]   ;;  %s118_s11 = smov [#allocation4]  }
   0x2   :  { %s15_s10 = sshll.u32 %s117_s9, 4  ;;  %s25_s12 = sshll.u32 %s118_s11, 4  ;;  %s16_s10 = int_to_ptr.vmem [resolvable:$true] %s15_s10  ;;  %s26_s12 = int_to_ptr.vmem [resolvable:$true] %s25_s12 }
   0x3   :  { %s69_s15 = scalar_lea.hbm %s161_s0, 128 }
   0x4   :  { %p70_p0 = scmp.ne.s32.totalorder %s161_s0, %s69_s15  ;;  %p73_p1 = scmp.lt.u32.totalorder %s69_s15, %s161_s0 }
   0x6   :  { %p75_p2 = pnand %p73_p1, %p70_p0 }
   0x8   :  { %78 = shalt.err (!%p75_p2)
}
   0x9   :  { %s79_s20 = scalar_lea.vmem %s16_s10, 128  ;;  %p84_p4 = scmp.lt.s32.totalorder %s16_s10, %s16_s10 }
   0xa   :  { %p80_p3 = scmp.ne.s32.totalorder %s16_s10, %s79_s20  ;;  %p85_p5 = scmp.lt.s32.totalorder %s79_s20, %s79_s20 }
   0xc   :  { %p86_p6 = por %p85_p5, %p84_p4 }
   0xe   :  { %p87_p7 = pnand %p86_p6, %p80_p3 }
  0x10   :  { %90 = shalt.err (!%p87_p7)
}
  0x11   :  { %18 = dma.hbm_to_vmem [thread:$0]  %s161_s0, 128, %s16_s10, [#allocation3]  }
  0x12   :  { %s91_s25 = scalar_lea.hbm %s162_s1, 128 }
  0x13   :  { %p92_p8 = scmp.ne.s32.totalorder %s162_s1, %s91_s25  ;;  %p95_p9 = scmp.lt.u32.totalorder %s91_s25, %s162_s1 }
  0x15   :  { %p97_p10 = pnand %p95_p9, %p92_p8 }
  0x17   :  { %100 = shalt.err (!%p97_p10)
}
  0x18   :  { %s101_s30 = scalar_lea.vmem %s26_s12, 128  ;;  %p106_p12 = scmp.lt.s32.totalorder %s26_s12, %s26_s12 }
  0x19   :  { %p102_p11 = scmp.ne.s32.totalorder %s26_s12, %s101_s30  ;;  %p107_p13 = scmp.lt.s32.totalorder %s101_s30, %s101_s30 }
  0x1b   :  { %p108_p0 = por %p107_p13, %p106_p12 }
  0x1d   :  { %p109_p1 = pnand %p108_p0, %p102_p11 }
  0x1f   :  { %112 = shalt.err (!%p109_p1)
}
  0x20   :  { %28 = dma.hbm_to_vmem [thread:$0]  %s162_s1, 128, %s26_s12, [#allocation5]  }
  0x21   :  { %113 = dma.done.wait [#allocation3], 128  }
  0x22   :  { %114 = vsyncadd [#allocation3], 4294967168 }
  0x23   :  { %115 = dma.done.wait [#allocation5], 128  }
  0x24   :  { %116 = vsyncadd [#allocation5], 4294967168  ;;  %v35_v0 = vld [vmem:[#allocation2] sm:$0xff]  ;;  %v36_v7 = vld [vmem:[#allocation4] sm:$0xff]  ;;  %vm55_vm1 = vcmask 97280  }
  0x25   :  { %v40_v1 = vand.u32 2147483647, %v35_v0  ;;  %v37_v9 = vmax.f32 %v35_v0, 0.0  ;;  %v38_v10 = vmul.f32 %v36_v7, %v35_v0 }
  0x27   :  { %v41_v2 = vsub.f32 0.0, %v40_v1  ;;  %v39_v14 = vsub.f32 %v37_v9, %v38_v10 }
  0x29   :  { %v42_v3 = vmul.f32 1.442695, %v41_v2 }
  0x2b   :  { %65 = vpow2.f32 %v42_v3 }
  0x35   :  { %v66_v4 = vpop.eup %65 }
  0x36   :  { %v44_v5 = vadd.f32 1.0, %v66_v4  ;;  %v47_v6 = vmul.f32 -0.5, %v66_v4  ;;  %v50_v11 = vand.u32 2147483647, %v66_v4 }
  0x38   :  { %67 = vlog2.f32 %v44_v5  ;;  %v48_v8 = vadd.f32 1.0, %v47_v6  ;;  %vm51_vm0 = vcmp.lt.f32.partialorder %v50_v11, 0.0004427343 }
  0x3a   :  { %v49_v12 = vmul.f32 %v66_v4, %v48_v8 }
  0x42   :  { %v68_v13 = vpop.eup %67 }
  0x43   :  { %v46_v15 = vmul.f32 0.6931472, %v68_v13 }
  0x45   :  { %v52_v16 = vsel %vm51_vm0, %v49_v12, %v46_v15 }
  0x46   :  { %v53_v17 = vadd.f32 %v52_v16, %v39_v14 }
  0x48   :  { %56 = vst.msk [vmem:[%s163_s2] sm:$0xff] %vm55_vm1, %v53_v17 }
  0x49   :  { %61 = vsyncpa [#allocation3], 1 }
  0x4a   :  { %62 = vsyncpa [#allocation5], 1 }

</bundles_post_ra>
